<compile_context>
chip_gen: v6e
topology: v6e:2x2x1
jax: 0.10.0
libtpu: 0.0.40
codegen_flags: <defaults>
</compile_context>

<pallas_src>
import jax
import jax.numpy as jnp
from jax import lax
from jax.experimental import pallas as pl
from jax.experimental.pallas import tpu as pltpu

# ---------------- configuration (small, consistent with the module) ----------
MAX_DEGREE = 8
NODE_EMBED_DIM = 16
HIDDEN_DIM = 32
NUM_LAYERS = 2
NUM_CLUSTERS = 4
OUTPUT_DIM = 16
NUM_ATTN_HEADS = 1             # attn_proj num_heads (=> squeeze path in forward)
BN_EPS = 1e-5

NODES_PER_GRAPH = 16
NUM_GRAPHS = 2
N_NODES = NODES_PER_GRAPH * NUM_GRAPHS

LAYER_IN_DIMS = [NODE_EMBED_DIM] + [HIDDEN_DIM] * (NUM_LAYERS - 1)
K_CLUSTERS = NUM_ATTN_HEADS * NUM_CLUSTERS


# ---------------- fused Pallas kernel -----------------------------------------
def sage_encoder_kernel(deg_ref, adjn_ref, emb_ref, w_ref, ss_ref, po_ref, out_ref):
    """Fused SAGEEncoder forward (single program, everything in VMEM).

    deg_ref  : [N, 1]  int32   node degree indices (embedding lookup keys)
    adjn_ref : [N, N]  f32     row-normalised adjacency (adj[i,j]/deg_i, j -> i)
    emb_ref  : [MAX_DEGREE+1, D0] f32  embedding table
    w_ref    : [sum_l 2*Din_l, H] f32  per-layer [wr; wl] blocks, concatenated
    ss_ref   : [2*L, H] f32            per-layer (scale, shift) rows (bias+BN folded)
    po_ref   : [H+1, K+Do] f32         [wp | wo] with a trailing bias row [bp | bo]
    out_ref  : [B*K, Do] f32
    """
    # --- embedding lookup as one-hot @ emb (MXU) -------------------------------
    idx = deg_ref[...]                                               # [N, 1] int32
    iota = lax.broadcasted_iota(jnp.int32, (N_NODES, MAX_DEGREE + 1), 1)
    onehot = (iota == idx).astype(jnp.float32)                       # [N, 9]
    h = jnp.dot(onehot, emb_ref[...], preferred_element_type=jnp.float32)  # [N, D0]

    adj_norm = adjn_ref[...]                                         # [N, N]
    ss = ss_ref[...]                                                 # [2L, H]

    # --- SAGE layers: one fused matmul per layer --------------------------------
    w_off = 0
    for l, din in enumerate(LAYER_IN_DIMS):
        agg = jnp.dot(adj_norm, h, preferred_element_type=jnp.float32)     # [N, din]
        ha = jnp.concatenate([h, agg], axis=-1)                            # [N, 2*din]
        y = jnp.dot(ha, w_ref[w_off:w_off + 2 * din, :],
                    preferred_element_type=jnp.float32)                    # [N, H]
        y = y * ss[2 * l:2 * l + 1, :] + ss[2 * l + 1:2 * l + 2, :]        # bias+BN folded
        h = jnp.maximum(y, 0.0)                                            # ReLU; dropout=id
        w_off += 2 * din

    # --- attention pooling + output projection (contiguous per-graph slices) ---
    po = po_ref[...]                                                 # [H+1, K+Do]
    wp = po[:HIDDEN_DIM, :K_CLUSTERS]
    wo = po[:HIDDEN_DIM, K_CLUSTERS:]
    bp = po[HIDDEN_DIM:HIDDEN_DIM + 1, :K_CLUSTERS]
    bo = po[HIDDEN_DIM:HIDDEN_DIM + 1, K_CLUSTERS:]

    scores = jnp.dot(h, wp, preferred_element_type=jnp.float32) + bp  # [N, K]

    outs = []
    for b in range(NUM_GRAPHS):                                       # static, tiny B
        lo = b * NODES_PER_GRAPH
        s_b = scores[lo:lo + NODES_PER_GRAPH, :]                      # [16, K]
        h_b = h[lo:lo + NODES_PER_GRAPH, :]                           # [16, H]
        mx = jnp.max(s_b, axis=0, keepdims=True)                      # [1, K]
        e = jnp.exp(s_b - mx)
        w = e * pl.reciprocal(jnp.sum(e, axis=0, keepdims=True), approx=True)
        c = lax.dot_general(w, h_b, (((0,), (0,)), ((), ())),
                            preferred_element_type=jnp.float32)       # [K, H]
        outs.append(jnp.dot(c, wo, preferred_element_type=jnp.float32) + bo)

    out_ref[...] = jnp.concatenate(outs, axis=0)                      # single store [B*K, Do]


# ---------------- wrapper ------------------------------------------------------
def pack_params(params):
    """Pack the many tiny parameter tensors into 3 VMEM buffers (done once)."""
    w_blocks, ss_rows = [], []
    for lyr in params["layers"]:
        # order matches the kernel's concat([h, agg]): h @ wr + agg @ wl
        w_blocks.append(jnp.concatenate([lyr["wr"], lyr["wl"]], axis=0))
        ss_rows += [lyr["scale"], lyr["shift"]]
    wcat = jnp.concatenate(w_blocks, axis=0)                          # [sum 2*Din, H]
    ss = jnp.concatenate(ss_rows, axis=0)                             # [2L, H]
    po = jnp.concatenate(
        [jnp.concatenate([params["wp"], params["wo"]], axis=1),       # [H, K+Do]
         jnp.concatenate([params["bp"], params["bo"]], axis=1)],      # [1, K+Do]
        axis=0)                                                       # [H+1, K+Do]
    return wcat, ss, po


@jax.jit
def sage_encoder_forward(deg_idx, adj_norm, emb, wcat, ss, po):
    vmem = pl.BlockSpec(memory_space=pltpu.MemorySpace.VMEM)
    deg2 = deg_idx.reshape(N_NODES, 1).astype(jnp.int32)
    out = pl.pallas_call(
        sage_encoder_kernel,
        out_shape=jax.ShapeDtypeStruct((NUM_GRAPHS * NUM_CLUSTERS, OUTPUT_DIM),
                                       jnp.float32),
        in_specs=[vmem] * 6,
        out_specs=vmem,
    )(deg2, adj_norm, emb, wcat, ss, po)
    return out.reshape(NUM_GRAPHS, NUM_CLUSTERS, OUTPUT_DIM)


# ---------------- parameters / inputs ------------------------------------------
def init_params(key):
    ks = iter(jax.random.split(key, 8 * NUM_LAYERS + 8))
    params = {
        "emb": 0.2 * jax.random.normal(next(ks), (MAX_DEGREE + 1, NODE_EMBED_DIM),
                                       jnp.float32),
        "layers": [],
    }
    in_dim = NODE_EMBED_DIM
    for _ in range(NUM_LAYERS):
        wl = 0.3 * jax.random.normal(next(ks), (in_dim, HIDDEN_DIM), jnp.float32)
        wr = 0.3 * jax.random.normal(next(ks), (in_dim, HIDDEN_DIM), jnp.float32)
        bias = 0.1 * jax.random.normal(next(ks), (HIDDEN_DIM,), jnp.float32)
        gamma = 1.0 + 0.1 * jax.random.normal(next(ks), (HIDDEN_DIM,), jnp.float32)
        beta = 0.05 * jax.random.normal(next(ks), (HIDDEN_DIM,), jnp.float32)
        run_mean = 0.1 * jax.random.normal(next(ks), (HIDDEN_DIM,), jnp.float32)
        run_var = 1.0 + 0.2 * jax.random.uniform(next(ks), (HIDDEN_DIM,), jnp.float32)
        _ = next(ks)
        bn_scale = gamma / jnp.sqrt(run_var + BN_EPS)
        # fold conv bias + BatchNorm(eval): y = conv*scale + ((bias - mean)*scale + beta)
        shift = (bias - run_mean) * bn_scale + beta
        params["layers"].append({
            "wl": wl, "wr": wr,
            "scale": bn_scale.reshape(1, HIDDEN_DIM),
            "shift": shift.reshape(1, HIDDEN_DIM),
            # unfused copies for the pure-JAX reference
            "bias": bias, "gamma": gamma, "beta": beta,
            "run_mean": run_mean, "run_var": run_var,
        })
        in_dim = HIDDEN_DIM
    params["wp"] = 0.3 * jax.random.normal(next(ks), (HIDDEN_DIM, K_CLUSTERS), jnp.float32)
    params["bp"] = 0.1 * jax.random.normal(next(ks), (1, K_CLUSTERS), jnp.float32)
    params["wo"] = 0.3 * jax.random.normal(next(ks), (HIDDEN_DIM, OUTPUT_DIM), jnp.float32)
    params["bo"] = 0.1 * jax.random.normal(next(ks), (1, OUTPUT_DIM), jnp.float32)
    return params


def build_graph_data():
    """Two graphs: 16-node ring + a few chords each (degrees vary 2..4)."""
    edges = []
    chords = [(0, 5), (0, 9), (2, 11), (4, 13), (4, 7), (8, 15)]
    for g in range(NUM_GRAPHS):
        base = g * NODES_PER_GRAPH
        for i in range(NODES_PER_GRAPH):
            edges.append((base + i, base + (i + 1) % NODES_PER_GRAPH))
        for (a, b) in chords:
            edges.append((base + a, base + b))
    src = jnp.array([s for (s, d) in edges] + [d for (s, d) in edges], jnp.int32)
    dst = jnp.array([d for (s, d) in edges] + [s for (s, d) in edges], jnp.int32)
    # adj[i, j] = 1 iff edge j -> i   (message from src j aggregated at dst i)
    adj = jnp.zeros((N_NODES, N_NODES), jnp.float32).at[dst, src].set(1.0)
    deg = jnp.sum(adj, axis=1, keepdims=True)                         # in-degree
    inv_deg = jnp.where(deg > 0, 1.0 / jnp.maximum(deg, 1.0), 0.0)
    adj_norm = adj * inv_deg                                          # row-normalised, ONCE
    deg_idx = jnp.clip(deg[:, 0], 0, MAX_DEGREE).astype(jnp.int32)
    return deg_idx, adj, adj_norm


# ---------------- pure-JAX reference (mirrors the PyTorch module) ---------------
def reference_forward(deg_idx, adj, params):
    with jax.default_matmul_precision("highest"):
        x = params["emb"][deg_idx]
        deg = jnp.sum(adj, axis=1, keepdims=True)
        inv = jnp.where(deg > 0, 1.0 / jnp.maximum(deg, 1.0), 0.0)
        for lyr in params["layers"]:
            agg = jnp.dot(adj, x) * inv
            y = jnp.dot(agg, lyr["wl"]) + jnp.dot(x, lyr["wr"]) + lyr["bias"]
            y = ((y - lyr["run_mean"]) / jnp.sqrt(lyr["run_var"] + BN_EPS)
                 * lyr["gamma"] + lyr["beta"])
            x = jnp.maximum(y, 0.0)
        scores = jnp.dot(x, params["wp"]) + params["bp"]
        outs = []
        for g in range(NUM_GRAPHS):
            sl = slice(g * NODES_PER_GRAPH, (g + 1) * NODES_PER_GRAPH)
            w = jax.nn.softmax(scores[sl], axis=0)
            c = jnp.dot(w.T, x[sl])
            outs.append(jnp.dot(c, params["wo"]) + params["bo"])
        return jnp.stack(outs, axis=0)


if __name__ == "__main__":
    key = jax.random.PRNGKey(0)
    params = init_params(key)
    deg_idx, adj, adj_norm = build_graph_data()
    wcat, ss, po = pack_params(params)

    out = sage_encoder_forward(deg_idx, adj_norm, params["emb"], wcat, ss, po)
    out = jax.block_until_ready(out)

    assert out.shape == (NUM_GRAPHS, NUM_CLUSTERS, OUTPUT_DIM)
    assert bool(jnp.all(jnp.isfinite(out)))

    ref = reference_forward(deg_idx, adj, params)
    max_diff = float(jnp.max(jnp.abs(out - ref)))
    max_ref = float(jnp.max(jnp.abs(ref)))
    assert max_diff < 5e-2 * (1.0 + max_ref), (max_diff, max_ref)

    print("KERNEL_OK")
</pallas_src>

<mosaic_0001>
module attributes {stable_mosaic.version = 11 : i64} {
  func.func @sage_encoder_kernel(%arg0: memref<32x1xi32, #tpu.memory_space<vmem>>, %arg1: memref<32x32xf32, #tpu.memory_space<vmem>>, %arg2: memref<9x16xf32, #tpu.memory_space<vmem>>, %arg3: memref<96x32xf32, #tpu.memory_space<vmem>>, %arg4: memref<4x32xf32, #tpu.memory_space<vmem>>, %arg5: memref<33x20xf32, #tpu.memory_space<vmem>>, %arg6: memref<8x16xf32, #tpu.memory_space<vmem>>) attributes {dimension_semantics = [], scalar_prefetch = 0 : i64, scratch_operands = 0 : i64, tpu.core_type = #tpu.core_type<tc>} {
    %c0 = arith.constant 0 : index
    %c0_0 = arith.constant 0 : index
    %0 = vector.load %arg0[%c0, %c0_0] : memref<32x1xi32, #tpu.memory_space<vmem>>, vector<32x1xi32>
    %1 = tpu.iota {dimensions = array<i32: 1>} : vector<32x9xi32>
    %2 = vector.broadcast %0 : vector<32x1xi32> to vector<32x9xi32>
    %3 = arith.cmpi eq, %1, %2 : vector<32x9xi32>
    %4 = arith.extui %3 : vector<32x9xi1> to vector<32x9xi32>
    %5 = arith.sitofp %4 : vector<32x9xi32> to vector<32x9xf32>
    %c0_1 = arith.constant 0 : index
    %c0_2 = arith.constant 0 : index
    %6 = vector.load %arg2[%c0_1, %c0_2] : memref<9x16xf32, #tpu.memory_space<vmem>>, vector<9x16xf32>
    %cst = arith.constant dense<0.000000e+00> : vector<32x16xf32>
    %7 = tpu.matmul %5, %6, %cst {dimension_numbers = #tpu.dot_dimension_numbers<[1], [0], [0], [1], [0, 0, 1, 1], [], []>} : vector<32x9xf32>, vector<9x16xf32>, vector<32x16xf32> -> vector<32x16xf32>
    %c0_3 = arith.constant 0 : index
    %c0_4 = arith.constant 0 : index
    %8 = vector.load %arg1[%c0_3, %c0_4] : memref<32x32xf32, #tpu.memory_space<vmem>>, vector<32x32xf32>
    %c0_5 = arith.constant 0 : index
    %c0_6 = arith.constant 0 : index
    %9 = vector.load %arg4[%c0_5, %c0_6] : memref<4x32xf32, #tpu.memory_space<vmem>>, vector<4x32xf32>
    %cst_7 = arith.constant dense<0.000000e+00> : vector<32x16xf32>
    %10 = tpu.matmul %8, %7, %cst_7 {dimension_numbers = #tpu.dot_dimension_numbers<[1], [0], [0], [1], [0, 0, 1, 1], [], []>} : vector<32x32xf32>, vector<32x16xf32>, vector<32x16xf32> -> vector<32x16xf32>
    %11 = tpu.concatenate %7, %10 in 1 : vector<32x16xf32>, vector<32x16xf32> -> vector<32x32xf32>
    %c0_8 = arith.constant 0 : index
    %c0_9 = arith.constant 0 : index
    %12 = vector.load %arg3[%c0_8, %c0_9] : memref<96x32xf32, #tpu.memory_space<vmem>>, vector<32x32xf32>
    %cst_10 = arith.constant dense<0.000000e+00> : vector<32x32xf32>
    %13 = tpu.matmul %11, %12, %cst_10 {dimension_numbers = #tpu.dot_dimension_numbers<[1], [0], [0], [1], [0, 0, 1, 1], [], []>} : vector<32x32xf32>, vector<32x32xf32>, vector<32x32xf32> -> vector<32x32xf32>
    %14 = vector.extract_strided_slice %9 {offsets = [0, 0], sizes = [1, 32], strides = [1, 1]} : vector<4x32xf32> to vector<1x32xf32>
    %15 = vector.broadcast %14 : vector<1x32xf32> to vector<32x32xf32>
    %16 = arith.mulf %13, %15 : vector<32x32xf32>
    %17 = vector.extract_strided_slice %9 {offsets = [1, 0], sizes = [1, 32], strides = [1, 1]} : vector<4x32xf32> to vector<1x32xf32>
    %18 = vector.broadcast %17 : vector<1x32xf32> to vector<32x32xf32>
    %19 = arith.addf %16, %18 : vector<32x32xf32>
    %cst_11 = arith.constant 0.000000e+00 : f32
    %20 = vector.broadcast %cst_11 : f32 to vector<32x32xf32>
    %21 = arith.maximumf %19, %20 : vector<32x32xf32>
    %cst_12 = arith.constant dense<0.000000e+00> : vector<32x32xf32>
    %22 = tpu.matmul %8, %21, %cst_12 {dimension_numbers = #tpu.dot_dimension_numbers<[1], [0], [0], [1], [0, 0, 1, 1], [], []>} : vector<32x32xf32>, vector<32x32xf32>, vector<32x32xf32> -> vector<32x32xf32>
    %23 = tpu.concatenate %21, %22 in 1 : vector<32x32xf32>, vector<32x32xf32> -> vector<32x64xf32>
    %c32 = arith.constant 32 : index
    %c0_13 = arith.constant 0 : index
    %24 = vector.load %arg3[%c32, %c0_13] : memref<96x32xf32, #tpu.memory_space<vmem>>, vector<64x32xf32>
    %cst_14 = arith.constant dense<0.000000e+00> : vector<32x32xf32>
    %25 = tpu.matmul %23, %24, %cst_14 {dimension_numbers = #tpu.dot_dimension_numbers<[1], [0], [0], [1], [0, 0, 1, 1], [], []>} : vector<32x64xf32>, vector<64x32xf32>, vector<32x32xf32> -> vector<32x32xf32>
    %26 = vector.extract_strided_slice %9 {offsets = [2, 0], sizes = [1, 32], strides = [1, 1]} : vector<4x32xf32> to vector<1x32xf32>
    %27 = vector.broadcast %26 : vector<1x32xf32> to vector<32x32xf32>
    %28 = arith.mulf %25, %27 : vector<32x32xf32>
    %29 = vector.extract_strided_slice %9 {offsets = [3, 0], sizes = [1, 32], strides = [1, 1]} : vector<4x32xf32> to vector<1x32xf32>
    %30 = vector.broadcast %29 : vector<1x32xf32> to vector<32x32xf32>
    %31 = arith.addf %28, %30 : vector<32x32xf32>
    %cst_15 = arith.constant 0.000000e+00 : f32
    %32 = vector.broadcast %cst_15 : f32 to vector<32x32xf32>
    %33 = arith.maximumf %31, %32 : vector<32x32xf32>
    %c0_16 = arith.constant 0 : index
    %c0_17 = arith.constant 0 : index
    %34 = vector.load %arg5[%c0_16, %c0_17] : memref<33x20xf32, #tpu.memory_space<vmem>>, vector<33x20xf32>
    %35 = vector.extract_strided_slice %34 {offsets = [0, 0], sizes = [32, 4], strides = [1, 1]} : vector<33x20xf32> to vector<32x4xf32>
    %36 = vector.extract_strided_slice %34 {offsets = [0, 4], sizes = [32, 16], strides = [1, 1]} : vector<33x20xf32> to vector<32x16xf32>
    %37 = vector.extract_strided_slice %34 {offsets = [32, 0], sizes = [1, 4], strides = [1, 1]} : vector<33x20xf32> to vector<1x4xf32>
    %38 = vector.extract_strided_slice %34 {offsets = [32, 4], sizes = [1, 16], strides = [1, 1]} : vector<33x20xf32> to vector<1x16xf32>
    %cst_18 = arith.constant dense<0.000000e+00> : vector<32x4xf32>
    %39 = tpu.matmul %33, %35, %cst_18 {dimension_numbers = #tpu.dot_dimension_numbers<[1], [0], [0], [1], [0, 0, 1, 1], [], []>} : vector<32x32xf32>, vector<32x4xf32>, vector<32x4xf32> -> vector<32x4xf32>
    %40 = vector.broadcast %37 : vector<1x4xf32> to vector<32x4xf32>
    %41 = arith.addf %39, %40 : vector<32x4xf32>
    %42 = vector.extract_strided_slice %41 {offsets = [0, 0], sizes = [16, 4], strides = [1, 1]} : vector<32x4xf32> to vector<16x4xf32>
    %43 = vector.extract_strided_slice %33 {offsets = [0, 0], sizes = [16, 32], strides = [1, 1]} : vector<32x32xf32> to vector<16x32xf32>
    %cst_19 = arith.constant dense<0xFF800000> : vector<4xf32>
    %44 = vector.multi_reduction <maximumf>, %42, %cst_19 [0] : vector<16x4xf32> to vector<4xf32>
    %45 = vector.shape_cast %44 : vector<4xf32> to vector<1x4xf32>
    %46 = vector.broadcast %45 : vector<1x4xf32> to vector<16x4xf32>
    %47 = arith.subf %42, %46 : vector<16x4xf32>
    %48 = math.exp %47 : vector<16x4xf32>
    %cst_20 = arith.constant dense<0.000000e+00> : vector<4xf32>
    %49 = vector.multi_reduction <add>, %48, %cst_20 [0] : vector<16x4xf32> to vector<4xf32>
    %50 = vector.shape_cast %49 : vector<4xf32> to vector<1x4xf32>
    %51 = tpu.reciprocal %50 {approx = true} : vector<1x4xf32> -> vector<1x4xf32>
    %52 = vector.broadcast %51 : vector<1x4xf32> to vector<16x4xf32>
    %53 = arith.mulf %48, %52 : vector<16x4xf32>
    %cst_21 = arith.constant dense<0.000000e+00> : vector<4x32xf32>
    %54 = tpu.matmul %53, %43, %cst_21 {dimension_numbers = #tpu.dot_dimension_numbers<[0], [0], [1], [1], [0, 1, 1, 1], [], []>} : vector<16x4xf32>, vector<16x32xf32>, vector<4x32xf32> -> vector<4x32xf32>
    %cst_22 = arith.constant dense<0.000000e+00> : vector<4x16xf32>
    %55 = tpu.matmul %54, %36, %cst_22 {dimension_numbers = #tpu.dot_dimension_numbers<[1], [0], [0], [1], [0, 0, 1, 1], [], []>} : vector<4x32xf32>, vector<32x16xf32>, vector<4x16xf32> -> vector<4x16xf32>
    %56 = vector.broadcast %38 : vector<1x16xf32> to vector<4x16xf32>
    %57 = arith.addf %55, %56 : vector<4x16xf32>
    %58 = vector.extract_strided_slice %41 {offsets = [16, 0], sizes = [16, 4], strides = [1, 1]} : vector<32x4xf32> to vector<16x4xf32>
    %59 = vector.extract_strided_slice %33 {offsets = [16, 0], sizes = [16, 32], strides = [1, 1]} : vector<32x32xf32> to vector<16x32xf32>
    %cst_23 = arith.constant dense<0xFF800000> : vector<4xf32>
    %60 = vector.multi_reduction <maximumf>, %58, %cst_23 [0] : vector<16x4xf32> to vector<4xf32>
    %61 = vector.shape_cast %60 : vector<4xf32> to vector<1x4xf32>
    %62 = vector.broadcast %61 : vector<1x4xf32> to vector<16x4xf32>
    %63 = arith.subf %58, %62 : vector<16x4xf32>
    %64 = math.exp %63 : vector<16x4xf32>
    %cst_24 = arith.constant dense<0.000000e+00> : vector<4xf32>
    %65 = vector.multi_reduction <add>, %64, %cst_24 [0] : vector<16x4xf32> to vector<4xf32>
    %66 = vector.shape_cast %65 : vector<4xf32> to vector<1x4xf32>
    %67 = tpu.reciprocal %66 {approx = true} : vector<1x4xf32> -> vector<1x4xf32>
    %68 = vector.broadcast %67 : vector<1x4xf32> to vector<16x4xf32>
    %69 = arith.mulf %64, %68 : vector<16x4xf32>
    %cst_25 = arith.constant dense<0.000000e+00> : vector<4x32xf32>
    %70 = tpu.matmul %69, %59, %cst_25 {dimension_numbers = #tpu.dot_dimension_numbers<[0], [0], [1], [1], [0, 1, 1, 1], [], []>} : vector<16x4xf32>, vector<16x32xf32>, vector<4x32xf32> -> vector<4x32xf32>
    %cst_26 = arith.constant dense<0.000000e+00> : vector<4x16xf32>
    %71 = tpu.matmul %70, %36, %cst_26 {dimension_numbers = #tpu.dot_dimension_numbers<[1], [0], [0], [1], [0, 0, 1, 1], [], []>} : vector<4x32xf32>, vector<32x16xf32>, vector<4x16xf32> -> vector<4x16xf32>
    %72 = vector.broadcast %38 : vector<1x16xf32> to vector<4x16xf32>
    %73 = arith.addf %71, %72 : vector<4x16xf32>
    %74 = tpu.concatenate %57, %73 in 0 : vector<4x16xf32>, vector<4x16xf32> -> vector<8x16xf32>
    %c0_27 = arith.constant 0 : index
    %c0_28 = arith.constant 0 : index
    %75 = vector.load %arg6[%c0_27, %c0_28] : memref<8x16xf32, #tpu.memory_space<vmem>>, vector<8x16xf32>
    tpu.vector_store %arg6[%c0_27, %c0_28], %74 {strides = array<i32>} : memref<8x16xf32, #tpu.memory_space<vmem>>, vector<8x16xf32>,
    return
  }
}

</mosaic_0001>

<bundles_post_ra>
// kernel: sage_encoder_forward.1
= control target key start
LH: loop header
LB: loop body
LE: loop exit
PB: predicated region body
PF: predicated region fallthrough
CT: control target
= control target key end

     0   :  { %vm69_vm0 = vcmask 1040384   ;;  %v1458_v2 = vmov 0   ;;  %s1715_s0 = inlined_call_operand.vmem [shape: s32[32,1], index: 0, kind: input, shape index: {}]   ;;  %s1716_s1 = inlined_call_operand.vmem [shape: f32[32,32], index: 1, kind: input, shape index: {}]   ;;  %s1717_s2 = inlined_call_operand.vmem [shape: f32[9,16], index: 2, kind: input, shape index: {}]   ;;  %s1718_s3 = inlined_call_operand.vmem [shape: f32[96,32], index: 3, kind: input, shape index: {}]   ;;  %s1719_s4 = inlined_call_operand.vmem [shape: f32[4,32], index: 4, kind: input, shape index: {}]   ;;  %s1720_s5 = inlined_call_operand.vmem [shape: f32[33,20], index: 5, kind: input, shape index: {}]   ;;  %s1721_s6 = inlined_call_operand.hbm [shape: f32[8,16], index: 6, kind: output, shape index: {}]  }
   0x1   :  { %v26_v0 = vld [vmem:[%s1715_s0 + $0x10] sm:$0xff]  ;;  %v24_v1 = vld [vmem:[%s1715_s0] sm:$0xff]  ;;  %1423 = vset.pattern.permute.xlu1 %v1458_v2  ;;  %1422 = vset.pattern.permute.xlu0 %v1458_v2  ;;  %v55_v3 = vld [vmem:[%s1717_s2 + $0x8] sm:$0x1] }
   0x2   :  { %37 = vperm.xlu1 %1423, %v26_v0   ;;  %31 = vperm.xlu0 %1422, %v24_v1   ;;  %v54_v4 = vld [vmem:[%s1717_s2] sm:$0xff] }
   0x3   :  { %11 = vsyncpa [#allocation3], 0  ;;  %v27_v5 = vld [vmem:[%s1715_s0 + $0x18] sm:$0xff]  ;;  %v25_v6 = vld [vmem:[%s1715_s0 + $0x8] sm:$0xff]  ;;  %1291 = vmatprep.subr.msk.mxu1 %vm69_vm0, %v55_v3  ;;  %v28_v7 = vlaneseq  ;;  %vm56_vm1 = vcmask 72704   ;;  %v1459_v11 = vmov 0.0  }
   0x4   :  { %1292 = vmatpush3.msk.msra.mxu1 %vm69_vm0, %v55_v3  ;;  %v158_v18 = vld [vmem:[%s1716_s1] sm:$0xff]  ;;  %vm163_vm6 = vcmask 261120   ;;  %v1530_v23 = vld [vmem:[%s1716_s1 + $0x8] sm:$0xff]  ;;  %v1535_v24 = vld [vmem:[%s1716_s1 + $0x10] sm:$0xff]  ;;  %s1460_s22 = smov 16   ;;  %vm277_vm7 = vcmask 130048  }
   0x5   :  { %1293 = vmatprep.subr.mxu1 %v54_v4  ;;  %v29_v8 = vand.u32 127, %v28_v7  ;;  %v1544_v25 = vld [vmem:[%s1716_s1 + $0x18] sm:$0xff]  ;;  %v284_v27 = vld [vmem:[%s1718_s3 + $0x10] sm:$0xff]  ;;  %v283_v28 = vld [vmem:[%s1718_s3 + $0x8] sm:$0xff]  ;;  %v1570_v42 = vshrl.u32 %v28_v7, 7  ;;  %s1461_s14 = smov 32  }
   0x6   :  { %40 = vperm.xlu1 %1423, %v27_v5   ;;  %34 = vperm.xlu0 %1422, %v25_v6   ;;  %v285_v26 = vld [vmem:[%s1718_s3 + $0x18] sm:$0xff]  ;;  %v282_v29 = vld [vmem:[%s1718_s3] sm:$0xff]  ;;  %v514_v1 = vld [vmem:[%s1718_s3 + $0x50] sm:$0xff]  ;;  %vm516_vm8 = vcmask 523264   ;;  %vm1462_vm9 = vmmov 0   ;;  %vm740_vm10 = vcmask 31744  }
   0x7   :  { %1294 = vmatpush3.msra.mxu1 %v54_v4  ;;  %1315 = vmatprep.subr.mxu0 %v285_v26  ;;  %v385_v43 = vsub.s32 0, %v1570_v42  ;;  %v1576_v44 = vld [vmem:[%s1719_s4] sm:$0xf]  ;;  %v393_v47 = vsub.s32 1, %v1570_v42  ;;  %v515_v0 = vld [vmem:[%s1718_s3 + $0x58] sm:$0xff]  ;;  %v513_v2 = vld [vmem:[%s1718_s3 + $0x48] sm:$0xff] }
   0x8   :  { %1316 = vmatpush3.msra.mxu0 %v285_v26  ;;  %v512_v3 = vld [vmem:[%s1718_s3 + $0x40] sm:$0xff]  ;;  %v511_v4 = vld [vmem:[%s1718_s3 + $0x38] sm:$0xff]  ;;  %v510_v5 = vld [vmem:[%s1718_s3 + $0x30] sm:$0xff]  ;;  %v624_v26 = vsub.s32 3, %v1570_v42  ;;  %s1464_s23 = smov [#allocation2]   ;;  %vm1174_vm11 = vcmask 1043456  }
   0x9   :  { %1317 = vmatprep.subr.mxu0 %v284_v27  ;;  %v386_v46 = vrot.slane %v1576_v44, %v385_v43  ;;  %v394_v51 = vrot.slane %v1576_v44, %v393_v47  ;;  %v509_v6 = vld [vmem:[%s1718_s3 + $0x28] sm:$0xff]  ;;  %v508_v7 = vld [vmem:[%s1718_s3 + $0x20] sm:$0xff]  ;;  %s1183_s24 = sshll.u32 %s1464_s23, 4  ;;  %s1184_s24 = int_to_ptr.vmem [resolvable:$true] %s1183_s24 }
   0xa   :  { %1318 = vmatpush3.msra.mxu0 %v284_v27  ;;  %s1436_s4 = scalar_lea.vmem %s1184_s24, 128  ;;  %p1441_p1 = scmp.lt.s32.totalorder %s1184_s24, %s1184_s24 }
   0xb   :  { %1319 = vmatprep.subr.mxu0 %v283_v28  ;;  %p1437_p0 = scmp.ne.s32.totalorder %s1184_s24, %s1436_s4  ;;  %p1442_p2 = scmp.lt.s32.totalorder %s1436_s4, %s1436_s4 }
   0xc   :  { %1320 = vmatpush3.msra.mxu0 %v283_v28 }
   0xd   :  { %1321 = vmatprep.subr.mxu0 %v282_v29  ;;  %p1443_p3 = por %p1442_p2, %p1441_p1 }
   0xe   :  { %1322 = vmatpush3.msra.mxu0 %v282_v29  ;;  %v625_v29 = vrot.slane %v1576_v44, %v624_v26 }
   0xf   :  { %1343 = vmatprep.subr.mxu0 %v515_v0  ;;  %p1444_p4 = pnand %p1443_p3, %p1437_p0 }
  0x7d   :  { %v38_v9 = vpop.permute.xlu1 %37  ;;  %v32_v10 = vpop.permute.xlu0 %31 }
  0x7e   :  { %vm42_vm2 = vcmp.eq.s32.totalorder %v29_v8, %v32_v10  ;;  %vm44_vm3 = vcmp.eq.s32.totalorder %v29_v8, %v38_v9 }
  0x7f   :  { %v1191_v12 = vsel %vm42_vm2, 1.0, %v1459_v11  ;;  %v1193_v15 = vsel %vm44_vm3, 1.0, %v1459_v11 }
  0x80   :  { %1295 = vmatprep.mubr.msk.f32.mxu1 %vm56_vm1, %v1191_v12 }
  0x81   :  { %v41_v13 = vpop.permute.xlu1 %40  ;;  %v35_v14 = vpop.permute.xlu0 %34 }
  0x82   :  { %vm43_vm4 = vcmp.eq.s32.totalorder %v29_v8, %v35_v14  ;;  %vm45_vm5 = vcmp.eq.s32.totalorder %v29_v8, %v41_v13 }
  0x83   :  { %v1192_v16 = vsel %vm43_vm4, 1.0, %v1459_v11  ;;  %v1194_v17 = vsel %vm45_vm5, 1.0, %v1459_v11 }
  0x84   :  { %1296 = vmatmul.mubr.msk.f32.vlgmr.msra.gmra.mxu1 %vm56_vm1, %v1192_v16 }
  0x85   :  { %1298 = vmatprep.mubr.msk.f32.mxu1 %vm56_vm1, %v1193_v15 }
  0x88   :  { %1299 = vmatmul.mubr.msk.f32.gmra.mxu1 %vm56_vm1, %v1194_v17 }
  0x89   :  { %1309 = vmatprep.mubr.msk.f32.mxu1 %vm163_vm6, %v158_v18 }
 0x144   :  { %v1297_v19 = vpop.f32.mrf.mxu1 }
 0x146   :  { %v139_v20 = vpop.f32.mrf.mxu1 }
 0x148   :  { %v1300_v21 = vpop.f32.mrf.mxu1 }
 0x149   :  { %1301 = vmatprep.subr.mxu1 %v1300_v21 }
 0x14a   :  { %v149_v22 = vpop.f32.mrf.mxu1  ;;  %1302 = vmatpush3.msra.mxu1 %v1300_v21 }
 0x14b   :  { %1303 = vmatprep.subr.mxu1 %v149_v22 }
 0x14c   :  { %1304 = vmatpush3.msra.mxu1 %v149_v22 }
 0x14d   :  { %1305 = vmatprep.subr.mxu1 %v1297_v19 }
 0x14e   :  { %1306 = vmatpush3.msra.mxu1 %v1297_v19 }
 0x14f   :  { %1307 = vmatprep.subr.mxu1 %v139_v20 }
 0x150   :  { %1308 = vmatpush3.msra.mxu1 %v139_v20 }
 0x151   :  { %1310 = vmatmul.mubr.msk.f32.vlgmr.msra.gmra.mxu1 %vm163_vm6, %v1530_v23 }
 0x152   :  { %1312 = vmatprep.mubr.msk.f32.mxu1 %vm163_vm6, %v1535_v24 }
 0x155   :  { %1313 = vmatmul.mubr.msk.f32.gmra.mxu1 %vm163_vm6, %v1544_v25 }
 0x156   :  { %1337 = vmatprep.mubr.msk.f32.mxu1 %vm163_vm6, %v158_v18 }
 0x211   :  { %v1311_v30 = vpop.f32.mrf.mxu1 }
 0x212   :  { %267 = vrot.lane.b32.xlu1 %v1311_v30, %s1460_s22 }
 0x213   :  { %v242_v31 = vpop.f32.mrf.mxu1 }
 0x214   :  { %265 = vrot.lane.b32.xlu0 %v242_v31, %s1460_s22 }
 0x215   :  { %v1314_v32 = vpop.f32.mrf.mxu1 }
 0x216   :  { %271 = vrot.lane.b32.xlu1 %v1314_v32, %s1460_s22 }
 0x217   :  { %v252_v33 = vpop.f32.mrf.mxu1 }
 0x218   :  { %269 = vrot.lane.b32.xlu0 %v252_v33, %s1460_s22 }
 0x284   :  { %v268_v34 = vpop.permute.xlu1 %267 }
 0x285   :  { %v279_v37 = vsel %vm277_vm7, %v1297_v19, %v268_v34 }
 0x286   :  { %v266_v35 = vpop.permute.xlu0 %265 }
 0x287   :  { %v278_v36 = vsel %vm277_vm7, %v139_v20, %v266_v35 }
 0x288   :  { %1323 = vmatprep.mubr.msk.f32.mxu0 %vm163_vm6, %v278_v36  ;;  %v272_v38 = vpop.permute.xlu1 %271 }
 0x289   :  { %1324 = vmatmul.mubr.msk.f32.vlgmr.msra.gmra.mxu0 %vm163_vm6, %v279_v37  ;;  %v281_v41 = vsel %vm277_vm7, %v1300_v21, %v272_v38  ;;  %v1619_v21 = vld [vmem:[%s1720_s5 + $0x18] sm:$0xff] }
 0x28a   :  { %v270_v39 = vpop.permute.xlu0 %269  ;;  %1344 = vmatpush3.msra.mxu0 %v515_v0 }
 0x28b   :  { %v280_v40 = vsel %vm277_vm7, %v149_v22, %v270_v39  ;;  %1345 = vmatprep.subr.mxu0 %v514_v1  ;;  %v1626_v22 = vld [vmem:[%s1720_s5 + $0x10] sm:$0xff] }
 0x28c   :  { %1326 = vmatprep.mubr.msk.f32.mxu0 %vm163_vm6, %v280_v40  ;;  %1346 = vmatpush3.msra.mxu0 %v514_v1 }
 0x28d   :  { %1327 = vmatmul.mubr.msk.f32.gmra.mxu0 %vm163_vm6, %v281_v41  ;;  %1347 = vmatprep.subr.mxu0 %v513_v2 }
 0x28e   :  { %1348 = vmatpush3.msra.mxu0 %v513_v2 }
 0x28f   :  { %1349 = vmatprep.subr.mxu0 %v512_v3 }
 0x290   :  { %1350 = vmatpush3.msra.mxu0 %v512_v3 }
 0x291   :  { %1351 = vmatprep.subr.mxu0 %v511_v4 }
 0x292   :  { %1352 = vmatpush3.msra.mxu0 %v511_v4 }
 0x293   :  { %1353 = vmatprep.subr.mxu0 %v510_v5 }
 0x294   :  { %1354 = vmatpush3.msra.mxu0 %v510_v5 }
 0x295   :  { %1355 = vmatprep.subr.mxu0 %v509_v6 }
 0x296   :  { %1356 = vmatpush3.msra.mxu0 %v509_v6 }
 0x297   :  { %1357 = vmatprep.subr.mxu0 %v508_v7 }
 0x298   :  { %1358 = vmatpush3.msra.mxu0 %v508_v7 }
 0x299   :  { %1386 = vmatprep.subr.mxu0 %v1459_v11 }
 0x349   :  { %v1325_v45 = vpop.f32.mrf.mxu0 }
 0x34a   :  { %v388_v50 = vmul.f32 %v1325_v45, %v386_v46  ;;  %v1672_v45 = vld [vmem:[%s1720_s5 + $0x20] ss:$0 sm:$0xff] }
 0x34b   :  { %v364_v48 = vpop.f32.mrf.mxu0 }
 0x34c   :  { %v387_v54 = vmul.f32 %v386_v46, %v364_v48  ;;  %v396_v57 = vadd.f32 %v394_v51, %v388_v50 }
 0x34d   :  { %v1328_v49 = vpop.f32.mrf.mxu0 }
 0x34e   :  { %v390_v52 = vmul.f32 %v1328_v49, %v386_v46  ;;  %v395_v60 = vadd.f32 %v394_v51, %v387_v54  ;;  %v400_v62 = vmax.f32 %v396_v57, 0.0 }
 0x34f   :  { %v374_v53 = vpop.f32.mrf.mxu0 }
 0x350   :  { %v398_v55 = vadd.f32 %v394_v51, %v390_v52  ;;  %v389_v56 = vmul.f32 %v386_v46, %v374_v53  ;;  %v399_v63 = vmax.f32 %v395_v60, 0.0 }
 0x352   :  { %v402_v58 = vmax.f32 %v398_v55, 0.0  ;;  %v397_v59 = vadd.f32 %v394_v51, %v389_v56 }
 0x354   :  { %v401_v61 = vmax.f32 %v397_v59, 0.0  ;;  %1329 = vmatprep.subr.mxu1 %v402_v58 }
 0x355   :  { %1330 = vmatpush3.msra.mxu1 %v402_v58 }
 0x356   :  { %1331 = vmatprep.subr.mxu1 %v401_v61 }
 0x357   :  { %1332 = vmatpush3.msra.mxu1 %v401_v61 }
 0x358   :  { %1333 = vmatprep.subr.mxu1 %v400_v62 }
 0x359   :  { %1334 = vmatpush3.msra.mxu1 %v400_v62 }
 0x35a   :  { %1335 = vmatprep.subr.mxu1 %v399_v63 }
 0x35b   :  { %1336 = vmatpush3.msra.mxu1 %v399_v63 }
 0x35c   :  { %1338 = vmatmul.mubr.msk.f32.vlgmr.msra.gmra.mxu1 %vm163_vm6, %v1530_v23  ;;  %1365 = vmatprep.subr.mxu1 %v1619_v21  ;;  %v1633_v23 = vld [vmem:[%s1720_s5 + $0x8] sm:$0xff] }
 0x35d   :  { %1340 = vmatprep.mubr.msk.f32.mxu1 %vm163_vm6, %v1535_v24  ;;  %1366 = vmatpush3.msra.mxu1 %v1619_v21  ;;  %v1640_v24 = vld [vmem:[%s1720_s5] sm:$0xff]  ;;  %s1463_s5 = smov 124  }
 0x35e   :  { %1367 = vmatprep.subr.mxu1 %v1626_v22 }
 0x35f   :  { %1368 = vmatpush3.msra.mxu1 %v1626_v22 }
 0x360   :  { %1341 = vmatmul.mubr.msk.f32.gmra.mxu1 %vm163_vm6, %v1544_v25  ;;  %1369 = vmatprep.subr.mxu1 %v1633_v23  ;;  %v616_v25 = vsub.s32 2, %v1570_v42 }
 0x361   :  { %1370 = vmatpush3.msra.mxu1 %v1633_v23 }
 0x362   :  { %1371 = vmatprep.subr.mxu1 %v1640_v24  ;;  %v617_v27 = vrot.slane %v1576_v44, %v616_v25 }
 0x363   :  { %1372 = vmatpush3.msra.mxu1 %v1640_v24 }
 0x364   :  { %1379 = vmatprep.subr.mxu1 %v1459_v11 }
 0x41c   :  { %v1339_v8 = vpop.f32.mrf.mxu1 }
 0x41d   :  { %494 = vrot.lane.b32.xlu1 %v1339_v8, %s1461_s14 }
 0x41e   :  { %v469_v9 = vpop.f32.mrf.mxu1 }
 0x41f   :  { %492 = vrot.lane.b32.xlu0 %v469_v9, %s1461_s14 }
 0x420   :  { %v1342_v10 = vpop.f32.mrf.mxu1 }
 0x421   :  { %498 = vrot.lane.b32.xlu1 %v1342_v10, %s1461_s14 }
 0x422   :  { %v479_v12 = vpop.f32.mrf.mxu1 }
 0x423   :  { %496 = vrot.lane.b32.xlu0 %v479_v12, %s1461_s14 }
 0x48f   :  { %v495_v13 = vpop.permute.xlu1 %494 }
 0x490   :  { %v505_v16 = vsel %vm163_vm6, %v400_v62, %v495_v13 }
 0x491   :  { %v493_v14 = vpop.permute.xlu0 %492 }
 0x492   :  { %v504_v15 = vsel %vm163_vm6, %v399_v63, %v493_v14 }
 0x493   :  { %1359 = vmatprep.mubr.msk.f32.mxu0 %vm516_vm8, %v504_v15  ;;  %v499_v17 = vpop.permute.xlu1 %498 }
 0x494   :  { %1360 = vmatmul.mubr.msk.f32.vlgmr.msra.gmra.mxu0 %vm516_vm8, %v505_v16  ;;  %v507_v20 = vsel %vm163_vm6, %v402_v58, %v499_v17 }
 0x495   :  { %v497_v18 = vpop.permute.xlu0 %496 }
 0x496   :  { %v506_v19 = vsel %vm163_vm6, %v401_v61, %v497_v18 }
 0x497   :  { %1362 = vmatprep.mubr.msk.f32.mxu0 %vm516_vm8, %v506_v19 }
 0x498   :  { %1363 = vmatmul.mubr.msk.f32.gmra.mxu0 %vm516_vm8, %v507_v20 }
 0x499   :  { %1394 = vmatprep.mubr.msk.f32.mxu0 %vm1462_vm9, %v1459_v11 }
 0x554   :  { %v1361_v28 = vpop.f32.mrf.mxu0 }
 0x555   :  { %v619_v30 = vmul.f32 %v1361_v28, %v617_v27 }
 0x556   :  { %v595_v31 = vpop.f32.mrf.mxu0 }
 0x557   :  { %v618_v32 = vmul.f32 %v617_v27, %v595_v31  ;;  %v627_v33 = vadd.f32 %v625_v29, %v619_v30 }
 0x558   :  { %v1364_v34 = vpop.f32.mrf.mxu0 }
 0x559   :  { %v626_v35 = vadd.f32 %v625_v29, %v618_v32  ;;  %v621_v36 = vmul.f32 %v1364_v34, %v617_v27  ;;  %v631_v40 = vmax.f32 %v627_v33, 0.0 }
 0x55a   :  { %v605_v37 = vpop.f32.mrf.mxu0 }
 0x55b   :  { %v630_v38 = vmax.f32 %v626_v35, 0.0  ;;  %v620_v39 = vmul.f32 %v617_v27, %v605_v37  ;;  %v1649_v41 = vadd.f32 %v625_v29, %v621_v36 }
 0x55d   :  { %v1651_v43 = vadd.f32 %v625_v29, %v620_v39  ;;  %1373 = vmatprep.mubr.msk.f32.mxu1 %vm163_vm6, %v630_v38  ;;  %v633_v44 = vmax.f32 %v1649_v41, 0.0 }
 0x55e   :  { %1374 = vmatmul.mubr.msk.f32.vlgmr.msra.gmra.mxu1 %vm163_vm6, %v631_v40 }
 0x55f   :  { %v632_v42 = vmax.f32 %v1651_v43, 0.0  ;;  %1380 = vmatpush3.msra.mxu1 %v631_v40 }
 0x560   :  { %1381 = vmatprep.subr.mxu1 %v1459_v11 }
 0x561   :  { %1382 = vmatpush3.msra.mxu1 %v630_v38  ;;  %1376 = vmatprep.mubr.msk.f32.mxu1 %vm163_vm6, %v632_v42 }
 0x562   :  { %1377 = vmatmul.mubr.msk.f32.gmra.mxu1 %vm163_vm6, %v633_v44  ;;  %1397 = vmatprep.subr.mxu1 %v1459_v11 }
 0x563   :  { %1383 = vmatprep.mubr.msk.f32.mxu1 %vm1462_vm9, %v1459_v11 }
 0x61e   :  { %v1375_v46 = vpop.f32.mrf.mxu1 }
 0x61f   :  { %v727_v47 = vadd.f32 %v1375_v46, %v1672_v45 }
 0x620   :  { %v721_v48 = vpop.f32.mrf.mxu1 }
 0x621   :  { %v722_v49 = vadd.f32 %v1672_v45, %v721_v48  ;;  %v742_v51 = vsel %vm740_vm10, %v727_v47, -inf }
 0x622   :  { %v1378_v50 = vpop.f32.mrf.mxu1 }
 0x623   :  { %v741_v52 = vsel %vm740_vm10, %v722_v49, -inf  ;;  %v737_v53 = vadd.f32 %v1378_v50, %v1672_v45 }
 0x624   :  { %v743_v54 = vmax.f32 %v741_v52, %v742_v51  ;;  %v731_v55 = vpop.f32.mrf.mxu1 }
 0x625   :  { %v732_v56 = vadd.f32 %v1672_v45, %v731_v55  ;;  %v967_v58 = vsel %vm740_vm10, %v737_v53, -inf }
 0x626   :  { %v744_v57 = vrot.slane %v743_v54, 4 }
 0x627   :  { %v966_v59 = vsel %vm740_vm10, %v732_v56, -inf }
 0x628   :  { %v745_v60 = vmax.f32 %v743_v54, %v744_v57  ;;  %v968_v61 = vmax.f32 %v966_v59, %v967_v58 }
 0x62a   :  { %v746_v62 = vrot.slane %v745_v60, 2  ;;  %v969_v63 = vrot.slane %v968_v61, 4 }
 0x62c   :  { %v747_v0 = vmax.f32 %v745_v60, %v746_v62  ;;  %v970_v1 = vmax.f32 %v968_v61, %v969_v63 }
 0x62e   :  { %v748_v2 = vrot.slane %v747_v0, 1  ;;  %v971_v3 = vrot.slane %v970_v1, 2 }
 0x630   :  { %v749_v4 = vmax.f32 %v747_v0, %v748_v2  ;;  %v972_v5 = vmax.f32 %v970_v1, %v971_v3 }
 0x632   :  { %v750_v6 = vsub.f32 %v722_v49, %v749_v4  ;;  %v751_v7 = vsub.f32 %v727_v47, %v749_v4  ;;  %v973_v8 = vrot.slane %v972_v5, 1 }
 0x634   :  { %v752_v9 = vmul.f32 1.442695, %v750_v6  ;;  %v754_v10 = vmul.f32 1.442695, %v751_v7  ;;  %v974_v12 = vmax.f32 %v972_v5, %v973_v8 }
 0x636   :  { %1424 = vpow2.f32 %v752_v9  ;;  %v975_v13 = vsub.f32 %v732_v56, %v974_v12  ;;  %v976_v14 = vsub.f32 %v737_v53, %v974_v12 }
 0x637   :  { %1426 = vpow2.f32 %v754_v10 }
 0x638   :  { %v977_v15 = vmul.f32 1.442695, %v975_v13  ;;  %v979_v16 = vmul.f32 1.442695, %v976_v14 }
 0x63a   :  { %1428 = vpow2.f32 %v977_v15 }
 0x63b   :  { %1430 = vpow2.f32 %v979_v16 }
 0x643   :  { %v1425_v17 = vpop.eup %1424 }
 0x644   :  { %v1427_v18 = vpop.eup %1426  ;;  %v756_v19 = vsel %vm740_vm10, %v1425_v17, 0.0 }
 0x645   :  { %v757_v20 = vsel %vm740_vm10, %v1427_v18, 0.0 }
 0x646   :  { %v758_v25 = vadd.f32 %v757_v20, %v756_v19 }
 0x647   :  { %v1429_v26 = vpop.eup %1428 }
 0x648   :  { %v1431_v27 = vpop.eup %1430  ;;  %v759_v28 = vrot.slane %v758_v25, 4  ;;  %v981_v29 = vsel %vm740_vm10, %v1429_v26, 0.0 }
 0x649   :  { %v982_v30 = vsel %vm740_vm10, %v1431_v27, 0.0 }
 0x64a   :  { %v760_v31 = vadd.f32 %v759_v28, %v758_v25  ;;  %v983_v32 = vadd.f32 %v982_v30, %v981_v29 }
 0x64c   :  { %v984_v33 = vrot.slane %v983_v32, 4  ;;  %v761_v34 = vrot.slane %v760_v31, 2 }
 0x64e   :  { %v985_v35 = vadd.f32 %v984_v33, %v983_v32  ;;  %v762_v36 = vadd.f32 %v761_v34, %v760_v31 }
 0x650   :  { %v763_v37 = vrot.slane %v762_v36, 1  ;;  %v986_v38 = vrot.slane %v985_v35, 2 }
 0x652   :  { %v764_v39 = vadd.f32 %v763_v37, %v762_v36  ;;  %v987_v40 = vadd.f32 %v986_v38, %v985_v35 }
 0x654   :  { %1432 = vrcp.f32 %v764_v39  ;;  %v988_v46 = vrot.slane %v987_v40, 1 }
 0x656   :  { %v989_v47 = vadd.f32 %v988_v46, %v987_v40 }
 0x658   :  { %1434 = vrcp.f32 %v989_v47 }
 0x661   :  { %v1433_v48 = vpop.eup %1432 }
 0x662   :  { %v766_v49 = vmul.f32 %v1433_v48, %v1425_v17  ;;  %v767_v52 = vmul.f32 %v1433_v48, %v1427_v18 }
 0x664   :  { %768 = vxpose.xlu0.b32.start [1/2] (short) (narrow) %v766_v49, 8 }
 0x665   :  { %v1435_v50 = vpop.eup %1434 }
 0x666   :  { %v991_v51 = vmul.f32 %v1435_v50, %v1429_v26  ;;  %v992_v53 = vmul.f32 %v1435_v50, %v1431_v27 }
 0x668   :  { %993 = vxpose.xlu1.b32.start [1/2] (short) (narrow) %v991_v51, 8  ;;  %769 = vxpose.xlu0.b32.end [2/2] (short) (narrow) %v767_v52, 8 }
 0x66c   :  { %994 = vxpose.xlu1.b32.end [2/2] (short) (narrow) %v992_v53, 8 }
 0x68a   :  { %881 = vrot.lane.b32.xlu1 %v1626_v22, %s1463_s5 }
 0x68e   :  { %877 = vrot.lane.b32.xlu1 %v1640_v24, %s1463_s5 }
 0x691   :  { %883 = vrot.lane.b32.xlu0 %v1619_v21, %s1463_s5 }
 0x695   :  { %879 = vrot.lane.b32.xlu0 %v1633_v23, %s1463_s5 }
 0x699   :  { %890 = vrot.lane.b32.xlu0 %v1672_v45, %s1463_s5 }
 0x6e0   :  { %v784_v54 = vpop.trf.xlu0 }
 0x6e1   :  { %1384 = vmatmul.mubr.msk.f32.vlgmr.msra.gmra.mxu1 %vm277_vm7, %v784_v54 }
 0x6e2   :  { %1398 = vmatpush3.msra.mxu1 %v633_v44  ;;  %1401 = vmatprep.mubr.msk.f32.mxu1 %vm1462_vm9, %v1459_v11 }
 0x6e3   :  { %1399 = vmatprep.subr.mxu1 %v1459_v11 }
 0x6e4   :  { %1400 = vmatpush3.msra.mxu1 %v632_v42  ;;  %v1009_v22 = vpop.trf.xlu1 }
 0x6e5   :  { %1402 = vmatmul.mubr.msk.f32.vlgmr.msra.gmra.mxu1 %vm277_vm7, %v1009_v22 }
 0x6fc   :  { %v882_v21 = vpop.permute.xlu1 %881 }
 0x700   :  { %v878_v41 = vpop.permute.xlu1 %877 }
 0x703   :  { %v884_v23 = vpop.permute.xlu0 %883 }
 0x704   :  { %1387 = vmatpush3.msra.mxu0 %v884_v23 }
 0x705   :  { %1388 = vmatprep.subr.mxu0 %v1459_v11 }
 0x706   :  { %1389 = vmatpush3.msra.mxu0 %v882_v21 }
 0x707   :  { %1390 = vmatprep.subr.mxu0 %v1459_v11  ;;  %v880_v24 = vpop.permute.xlu0 %879 }
 0x708   :  { %1391 = vmatpush3.msra.mxu0 %v880_v24 }
 0x709   :  { %1392 = vmatprep.subr.mxu0 %v1459_v11 }
 0x70a   :  { %1393 = vmatpush3.msra.mxu0 %v878_v41 }
 0x70b   :  { %1404 = vmatprep.subr.mxu0 %v1459_v11  ;;  %v891_v57 = vpop.permute.xlu0 %890 }
 0x7a1   :  { %v869_v43 = vpop.f32.mrf.mxu1 }
 0x7a2   :  { %1395 = vmatmul.mubr.msk.f32.vlgmr.msra.gmra.mxu0 %vm163_vm6, %v869_v43 }
 0x7a3   :  { %1405 = vmatpush3.msra.mxu0 %v884_v23  ;;  %v1385_v42 = vpop.f32.mrf.mxu1  ;;  %1412 = vmatprep.mubr.msk.f32.mxu0 %vm1462_vm9, %v1459_v11 }
 0x7a4   :  { %1406 = vmatprep.subr.mxu0 %v1459_v11 }
 0x7a5   :  { %1407 = vmatpush3.msra.mxu0 %v882_v21  ;;  %v1094_v44 = vpop.f32.mrf.mxu1 }
 0x7a6   :  { %1408 = vmatprep.subr.mxu0 %v1459_v11 }
 0x7a7   :  { %1409 = vmatpush3.msra.mxu0 %v880_v24  ;;  %v1403_v45 = vpop.f32.mrf.mxu1 }
 0x7a8   :  { %1410 = vmatprep.subr.mxu0 %v1459_v11 }
 0x7a9   :  { %1411 = vmatpush3.msra.mxu0 %v878_v41 }
 0x7aa   :  { %1413 = vmatmul.mubr.msk.f32.vlgmr.msra.gmra.mxu0 %vm163_vm6, %v1094_v44 }
 0x862   :  { %v962_v55 = vpop.f32.mrf.mxu0 }
 0x863   :  { %v963_v61 = vadd.f32 %v962_v55, %v891_v57 }
 0x864   :  { %v1396_v56 = vpop.f32.mrf.mxu0 }
 0x86a   :  { %v1167_v58 = vpop.f32.mrf.mxu0 }
 0x86b   :  { %v1168_v59 = vadd.f32 %v1167_v58, %v891_v57 }
 0x86c   :  { %v1414_v60 = vpop.f32.mrf.mxu0 }
 0x86d   :  { %v1172_v62 = vrot.slane %v1168_v59, 4 }
 0x86f   :  { %v1175_v63 = vsel %vm1174_vm11, %v963_v61, %v1172_v62 }
 0x870   :  { %1176 = vst.msk [vmem:[#allocation2] sm:$0xff] %vm277_vm7, %v1175_v63 }
 0x871   :  { %1447 = shalt.err (!%p1444_p4)
}
 0x872   :  { %1186 = dma.vmem_to_hbm [thread:$0]  %s1184_s24, 128, %s1721_s6, [#allocation3]  }
 0x873   :  { %1456 = dma.done.wait [#allocation3], 128  }
 0x874   :  { %1457 = vsyncadd [#allocation3], 4294967168 }
 0x875   :  { %1190 = vsyncpa [#allocation3], 1 }

</bundles_post_ra>
